<compile_context>
chip_gen: v7x
topology: tpu7x:2x2x1
jax: 0.10.0
libtpu: 0.0.40
codegen_flags: <defaults>
</compile_context>

<pallas_src>
import functools

import jax
import jax.numpy as jnp
from jax.experimental import pallas as pl
from jax.experimental.pallas import tpu as pltpu


def _round_up(x, m):
    return (x + m - 1) // m * m


def _spectral_pair_kernel(ti_ref, tj_ref, xih_ref, xil_ref, xjh_ref, xjl_ref,
                          w_ref, ncol_ref, nrow_ref, o_ref, *scratch,
                          tile_b, tile_k, single_k, xi_resident):
    # ti_ref / tj_ref : SMEM scalar-prefetch, [n_tiles] row/col tile ids
    # xih/xil_ref     : bf16 hi/lo of x rows, i-side ((T, Dp) resident or (T, TK))
    # xjh/xjl_ref     : bf16 hi/lo of x rows, j-side (T, TK)
    # w_ref           : (T, T) symmetrized adjacency weights for this tile pair
    # ncol_ref/nrow_ref: (T, 1) / (1, T) f32 squared norms
    # o_ref           : (1, 1, T) lane-dense per-tile partial sums (per column)
    # scratch         : [] (single_k) or [(T, T) f32 Gram accumulator]
    t = pl.program_id(0)
    k = pl.program_id(1)
    nk = pl.num_programs(1)

    if xi_resident and not single_k:
        off = pl.multiple_of(k * tile_k, tile_k)
        xih = xih_ref[:, pl.ds(off, tile_k)]
        xil = xil_ref[:, pl.ds(off, tile_k)]
    else:
        xih = xih_ref[...]
        xil = xil_ref[...]
    xjh = xjh_ref[...]
    xjl = xjl_ref[...]

    def _xxt(a, b):  # (T, TK) @ (T, TK)^T on the MXU, f32 accumulation
        return jax.lax.dot_general(
            a, b, dimension_numbers=(((1,), (1,)), ((), ())),
            preferred_element_type=jnp.float32)

    # bf16 "3-pass" emulation of the f32 Gram cross term (drops lo*lo, ~2^-18).
    g_part = _xxt(xih, xjh) + _xxt(xih, xjl) + _xxt(xil, xjh)

    def _epilogue(gram):
        # dist2[a,b] = ||x_a||^2 + ||x_b||^2 - 2 <x_a, x_b>
        dist2 = ncol_ref[...] + nrow_ref[...] - 2.0 * gram
        dist = jnp.sqrt(jnp.maximum(dist2, 0.0))          # cancellation guard
        is_diag = ti_ref[t] == tj_ref[t]

        @pl.when(jnp.logical_not(is_diag))
        def _():
            part = jnp.sum(w_ref[...] * dist, axis=0, keepdims=True)
            o_ref[...] = part.reshape(1, 1, tile_b)

        @pl.when(is_diag)
        def _():
            # torch.dist(x_i, x_i) == 0 exactly: kill the float residue on the
            # diagonal, and halve to undo the within-tile w+w.T double count.
            row = jax.lax.broadcasted_iota(jnp.int32, (tile_b, tile_b), 0)
            col = jax.lax.broadcasted_iota(jnp.int32, (tile_b, tile_b), 1)
            d = jnp.where(row == col, 0.0, dist)
            part = 0.5 * jnp.sum(w_ref[...] * d, axis=0, keepdims=True)
            o_ref[...] = part.reshape(1, 1, tile_b)

    if single_k:
        _epilogue(g_part)
    else:
        acc_ref = scratch[0]

        @pl.when(k == 0)
        def _():
            acc_ref[...] = g_part            # write, not zero + accumulate

        @pl.when(k > 0)
        def _():
            acc_ref[...] = acc_ref[...] + g_part

        @pl.when(k == nk - 1)
        def _():
            _epilogue(acc_ref[...])


def spectral_loss_pallas(batch_data, local_adjacent):
    """batch_data: [B, D], local_adjacent: [B, B] -> scalar loss."""
    B, D = batch_data.shape
    x = batch_data.astype(jnp.float32)
    w = local_adjacent.astype(jnp.float32)

    # ---- tiling ----------------------------------------------------------
    if B <= 128:
        T = _round_up(B, 8)      # single row-tile: every block == full array dim
    elif B <= 256:
        T = 128                  # >= 2 row-tiles so both v7x TensorCores get work
    else:
        T = 256                  # matches 256x256 MXU (v6e/v7x); v6e could use 512
    Bp = _round_up(B, T)
    n_t = Bp // T

    Dp = _round_up(D, 128)       # lane-dense feature dim (zero-pad is inert)
    if Dp <= 1024:
        # Collapse the K axis: no accumulator RMW, no per-k grid overhead.
        TK, n_k, single_k, xi_resident = Dp, 1, True, True
    else:
        single_k = False
        # TK always divides Dp (Dp is a multiple of 128) -> no K-padding waste.
        TK = 512 if Dp % 512 == 0 else (256 if Dp % 256 == 0 else 128)
        n_k = Dp // TK
        # Keep the i-side hi+lo stripe resident while its double-buffered
        # footprint stays <= 8 MiB (safe on v7x's 64 MiB VMEM core).
        xi_resident = 2 * (2 * T * Dp * 2) <= 8 * 1024 * 1024

    # ---- operand prep (all padding is semantically inert) ----------------
    x_p = jnp.zeros((Bp, Dp), jnp.float32).at[:B, :D].set(x)   # zero rows/cols
    w_sym = w + w.T                                            # dist symmetry
    w_p = jnp.zeros((Bp, Bp), jnp.float32).at[:B, :B].set(w_sym)

    # bf16 hi/lo split of x: 3 bf16 MXU passes ~= f32 Gram (norms stay f32).
    x_hi = x_p.astype(jnp.bfloat16)
    x_lo = (x_p - x_hi.astype(jnp.float32)).astype(jnp.bfloat16)

    sq = jnp.sum(x_p * x_p, axis=1)                            # exact f32 norms
    sq_col = sq.reshape(Bp, 1)
    sq_row = sq.reshape(1, Bp)

    # ---- flat upper-triangular tile list (scalar-prefetched) --------------
    ti_list, tj_list = [], []
    for i in range(n_t):
        for j in range(i, n_t):      # row-major: the i-side stripe stays resident
            ti_list.append(i)
            tj_list.append(j)
    n_tiles = len(ti_list)
    ti_arr = jnp.asarray(ti_list, jnp.int32)
    tj_arr = jnp.asarray(tj_list, jnp.int32)

    xi_block = (T, Dp) if xi_resident else (T, TK)
    if xi_resident:
        xi_map = lambda t, k, ti, tj: (ti[t], 0)
    else:
        xi_map = lambda t, k, ti, tj: (ti[t], k)
    xj_map = lambda t, k, ti, tj: (tj[t], k)

    kernel = functools.partial(_spectral_pair_kernel, tile_b=T, tile_k=TK,
                               single_k=single_k, xi_resident=xi_resident)

    partials = pl.pallas_call(
        kernel,
        out_shape=jax.ShapeDtypeStruct((n_tiles, 1, T), jnp.float32),
        grid_spec=pltpu.PrefetchScalarGridSpec(
            num_scalar_prefetch=2,
            grid=(n_tiles, n_k),
            in_specs=[
                pl.BlockSpec(xi_block, xi_map),                            # x_hi, i-side
                pl.BlockSpec(xi_block, xi_map),                            # x_lo, i-side
                pl.BlockSpec((T, TK), xj_map),                             # x_hi, j-side
                pl.BlockSpec((T, TK), xj_map),                             # x_lo, j-side
                pl.BlockSpec((T, T), lambda t, k, ti, tj: (ti[t], tj[t])), # weights
                pl.BlockSpec((T, 1), lambda t, k, ti, tj: (ti[t], 0)),     # ||x_i||^2
                pl.BlockSpec((1, T), lambda t, k, ti, tj: (0, tj[t])),     # ||x_j||^2
            ],
            out_specs=pl.BlockSpec((1, 1, T), lambda t, k, ti, tj: (t, 0, 0)),
            scratch_shapes=() if single_k else [pltpu.VMEM((T, T), jnp.float32)],
        ),
        compiler_params=pltpu.CompilerParams(
            dimension_semantics=("parallel", "arbitrary"),
            vmem_limit_bytes=32 * 1024 * 1024),
    )(ti_arr, tj_arr, x_hi, x_lo, x_hi, x_lo, w_p, sq_col, sq_row)

    # Lane b of tile t holds sum_a w*dist for that column; padded lanes are 0.
    return jnp.sum(partials) * (1.0 / (B * B))


@jax.jit
def spectral_loss(batch_data, batch_indexs, adjacent):
    """Full module forward: gather local adjacency (JAX glue) + Pallas kernel."""
    local_adjacent = adjacent[batch_indexs][:, batch_indexs]    # [B, B]
    return spectral_loss_pallas(batch_data, local_adjacent)


def _reference(batch_data, batch_indexs, adjacent):
    """Pure-JAX reference matching the PyTorch double loop."""
    local_adjacent = adjacent[batch_indexs][:, batch_indexs]
    diffs = batch_data[:, None, :] - batch_data[None, :, :]
    dist = jnp.sqrt(jnp.sum(diffs * diffs, axis=-1))
    b = batch_data.shape[0]
    return jnp.sum(local_adjacent * dist) / (b * b)


if __name__ == "__main__":
    key = jax.random.PRNGKey(0)
    k_adj, k_data, k_idx = jax.random.split(key, 3)

    N = 16    # total number of nodes in the (synthetic) adjacency matrix
    B = 8     # mini-batch size
    D = 32    # feature dim

    # Deterministic synthetic "adjacent" parameter (module __init__ takes an
    # NxN numpy adjacency); symmetric non-negative weights.
    adj_raw = jax.random.uniform(k_adj, (N, N), dtype=jnp.float32)
    adjacent = 0.5 * (adj_raw + adj_raw.T)

    batch_data = jax.random.normal(k_data, (B, D), dtype=jnp.float32)
    batch_indexs = jax.random.randint(k_idx, (B,), 0, N, dtype=jnp.int32)

    loss = spectral_loss(batch_data, batch_indexs, adjacent)
    loss = jax.block_until_ready(loss)

    ref = _reference(batch_data, batch_indexs, adjacent)
    assert jnp.allclose(loss, ref, rtol=1e-5, atol=1e-5), (loss, ref)

    print("KERNEL_OK")
</pallas_src>

<mosaic_0001>
module attributes {stable_mosaic.version = 11 : i64} {
  func.func @_spectral_pair_kernel(%arg0: i32, %arg1: i32, %arg2: memref<1xi32, #tpu.memory_space<smem>>, %arg3: memref<1xi32, #tpu.memory_space<smem>>, %arg4: memref<8x128xbf16, #tpu.memory_space<vmem>>, %arg5: memref<8x128xbf16, #tpu.memory_space<vmem>>, %arg6: memref<8x128xbf16, #tpu.memory_space<vmem>>, %arg7: memref<8x128xbf16, #tpu.memory_space<vmem>>, %arg8: memref<8x8xf32, #tpu.memory_space<vmem>>, %arg9: memref<8x1xf32, #tpu.memory_space<vmem>>, %arg10: memref<1x8xf32, #tpu.memory_space<vmem>>, %arg11: memref<1x1x8xf32, #tpu.memory_space<vmem>>) attributes {dimension_semantics = [#tpu.dimension_semantics<parallel>, #tpu.dimension_semantics<arbitrary>], iteration_bounds = array<i64: 1, 1>, scalar_prefetch = 2 : i64, scratch_operands = 0 : i64, tpu.core_type = #tpu.core_type<tc>, window_params = [{transform_indices = @transform_0, window_bounds = array<i64: 8, 128>}, {transform_indices = @transform_1, window_bounds = array<i64: 8, 128>}, {transform_indices = @transform_2, window_bounds = array<i64: 8, 128>}, {transform_indices = @transform_3, window_bounds = array<i64: 8, 128>}, {transform_indices = @transform_4, window_bounds = array<i64: 8, 8>}, {transform_indices = @transform_5, window_bounds = array<i64: 8, 1>}, {transform_indices = @transform_6, window_bounds = array<i64: 1, 8>}, {transform_indices = @transform_7, window_bounds = array<i64: 1, 1, 8>}]} {
    %c0 = arith.constant 0 : index
    %c0_0 = arith.constant 0 : index
    %0 = vector.load %arg4[%c0, %c0_0] : memref<8x128xbf16, #tpu.memory_space<vmem>>, vector<8x128xbf16>
    %c0_1 = arith.constant 0 : index
    %c0_2 = arith.constant 0 : index
    %1 = vector.load %arg5[%c0_1, %c0_2] : memref<8x128xbf16, #tpu.memory_space<vmem>>, vector<8x128xbf16>
    %c0_3 = arith.constant 0 : index
    %c0_4 = arith.constant 0 : index
    %2 = vector.load %arg6[%c0_3, %c0_4] : memref<8x128xbf16, #tpu.memory_space<vmem>>, vector<8x128xbf16>
    %c0_5 = arith.constant 0 : index
    %c0_6 = arith.constant 0 : index
    %3 = vector.load %arg7[%c0_5, %c0_6] : memref<8x128xbf16, #tpu.memory_space<vmem>>, vector<8x128xbf16>
    %cst = arith.constant dense<0.000000e+00> : vector<8x8xf32>
    %4 = tpu.matmul %0, %2, %cst {dimension_numbers = #tpu.dot_dimension_numbers<[1], [1], [0], [0], [0, 0, 1, 0], [], []>} : vector<8x128xbf16>, vector<8x128xbf16>, vector<8x8xf32> -> vector<8x8xf32>
    %cst_7 = arith.constant dense<0.000000e+00> : vector<8x8xf32>
    %5 = tpu.matmul %0, %3, %cst_7 {dimension_numbers = #tpu.dot_dimension_numbers<[1], [1], [0], [0], [0, 0, 1, 0], [], []>} : vector<8x128xbf16>, vector<8x128xbf16>, vector<8x8xf32> -> vector<8x8xf32>
    %6 = arith.addf %4, %5 : vector<8x8xf32>
    %cst_8 = arith.constant dense<0.000000e+00> : vector<8x8xf32>
    %7 = tpu.matmul %1, %2, %cst_8 {dimension_numbers = #tpu.dot_dimension_numbers<[1], [1], [0], [0], [0, 0, 1, 0], [], []>} : vector<8x128xbf16>, vector<8x128xbf16>, vector<8x8xf32> -> vector<8x8xf32>
    %8 = arith.addf %6, %7 : vector<8x8xf32>
    %c0_9 = arith.constant 0 : index
    %c0_10 = arith.constant 0 : index
    %9 = vector.load %arg9[%c0_9, %c0_10] : memref<8x1xf32, #tpu.memory_space<vmem>>, vector<8x1xf32>
    %c0_11 = arith.constant 0 : index
    %c0_12 = arith.constant 0 : index
    %10 = vector.load %arg10[%c0_11, %c0_12] : memref<1x8xf32, #tpu.memory_space<vmem>>, vector<1x8xf32>
    %11 = vector.broadcast %9 : vector<8x1xf32> to vector<8x8xf32>
    %12 = vector.broadcast %10 : vector<1x8xf32> to vector<8x8xf32>
    %13 = arith.addf %11, %12 : vector<8x8xf32>
    %cst_13 = arith.constant 2.000000e+00 : f32
    %14 = vector.broadcast %cst_13 : f32 to vector<8x8xf32>
    %15 = arith.mulf %14, %8 : vector<8x8xf32>
    %16 = arith.subf %13, %15 : vector<8x8xf32>
    %cst_14 = arith.constant 0.000000e+00 : f32
    %17 = vector.broadcast %cst_14 : f32 to vector<8x8xf32>
    %18 = arith.maximumf %16, %17 : vector<8x8xf32>
    %19 = math.sqrt %18 : vector<8x8xf32>
    %20 = arith.index_cast %arg0 : i32 to index
    %21 = memref.load %arg2[%20] : memref<1xi32, #tpu.memory_space<smem>>
    %22 = arith.index_cast %arg0 : i32 to index
    %23 = memref.load %arg3[%22] : memref<1xi32, #tpu.memory_space<smem>>
    %24 = arith.cmpi eq, %21, %23 : i32
    %true = arith.constant true
    %25 = arith.xori %24, %true : i1
    %26 = arith.extui %25 : i1 to i32
    %c0_i32 = arith.constant 0 : i32
    %27 = arith.cmpi ne, %26, %c0_i32 : i32
    scf.if %27 {
      %c0_16 = arith.constant 0 : index
      %c0_17 = arith.constant 0 : index
      %30 = vector.load %arg8[%c0_16, %c0_17] : memref<8x8xf32, #tpu.memory_space<vmem>>, vector<8x8xf32>
      %31 = arith.mulf %30, %19 : vector<8x8xf32>
      %cst_18 = arith.constant dense<0.000000e+00> : vector<8xf32>
      %32 = vector.multi_reduction <add>, %31, %cst_18 [0] : vector<8x8xf32> to vector<8xf32>
      %33 = vector.shape_cast %32 : vector<8xf32> to vector<1x8xf32>
      %34 = vector.shape_cast %33 : vector<1x8xf32> to vector<1x1x8xf32>
      %c0_19 = arith.constant 0 : index
      %c0_20 = arith.constant 0 : index
      %c0_21 = arith.constant 0 : index
      %35 = vector.load %arg11[%c0_19, %c0_20, %c0_21] : memref<1x1x8xf32, #tpu.memory_space<vmem>>, vector<1x1x8xf32>
      tpu.vector_store %arg11[%c0_19, %c0_20, %c0_21], %34 {strides = array<i32>} : memref<1x1x8xf32, #tpu.memory_space<vmem>>, vector<1x1x8xf32>,
    } else {
    }
    %28 = arith.extui %24 : i1 to i32
    %c0_i32_15 = arith.constant 0 : i32
    %29 = arith.cmpi ne, %28, %c0_i32_15 : i32
    scf.if %29 {
      %30 = tpu.iota {dimensions = array<i32: 0>} : vector<8x8xi32>
      %31 = tpu.iota {dimensions = array<i32: 1>} : vector<8x8xi32>
      %32 = arith.cmpi eq, %30, %31 : vector<8x8xi32>
      %cst_16 = arith.constant 0.000000e+00 : f32
      %33 = vector.broadcast %cst_16 : f32 to vector<8x8xf32>
      %34 = arith.select %32, %33, %19 : vector<8x8xi1>, vector<8x8xf32>
      %c0_17 = arith.constant 0 : index
      %c0_18 = arith.constant 0 : index
      %35 = vector.load %arg8[%c0_17, %c0_18] : memref<8x8xf32, #tpu.memory_space<vmem>>, vector<8x8xf32>
      %36 = arith.mulf %35, %34 : vector<8x8xf32>
      %cst_19 = arith.constant dense<0.000000e+00> : vector<8xf32>
      %37 = vector.multi_reduction <add>, %36, %cst_19 [0] : vector<8x8xf32> to vector<8xf32>
      %38 = vector.shape_cast %37 : vector<8xf32> to vector<1x8xf32>
      %cst_20 = arith.constant 5.000000e-01 : f32
      %39 = vector.broadcast %cst_20 : f32 to vector<1x8xf32>
      %40 = arith.mulf %39, %38 : vector<1x8xf32>
      %41 = vector.shape_cast %40 : vector<1x8xf32> to vector<1x1x8xf32>
      %c0_21 = arith.constant 0 : index
      %c0_22 = arith.constant 0 : index
      %c0_23 = arith.constant 0 : index
      %42 = vector.load %arg11[%c0_21, %c0_22, %c0_23] : memref<1x1x8xf32, #tpu.memory_space<vmem>>, vector<1x1x8xf32>
      tpu.vector_store %arg11[%c0_21, %c0_22, %c0_23], %41 {strides = array<i32>} : memref<1x1x8xf32, #tpu.memory_space<vmem>>, vector<1x1x8xf32>,
    } else {
    }
    return
  }
  func.func @transform_0(%arg0: i32, %arg1: i32, %arg2: memref<1xi32, #tpu.memory_space<smem>>, %arg3: memref<1xi32, #tpu.memory_space<smem>>) -> (i32, i32) {
    %0 = arith.index_cast %arg0 : i32 to index
    %1 = memref.load %arg2[%0] : memref<1xi32, #tpu.memory_space<smem>>
    %c0_i32 = arith.constant 0 : i32
    %c0_i32_0 = arith.constant 0 : i32
    return %1, %c0_i32 : i32, i32
  }
  func.func @transform_1(%arg0: i32, %arg1: i32, %arg2: memref<1xi32, #tpu.memory_space<smem>>, %arg3: memref<1xi32, #tpu.memory_space<smem>>) -> (i32, i32) {
    %0 = arith.index_cast %arg0 : i32 to index
    %1 = memref.load %arg2[%0] : memref<1xi32, #tpu.memory_space<smem>>
    %c0_i32 = arith.constant 0 : i32
    %c0_i32_0 = arith.constant 0 : i32
    return %1, %c0_i32 : i32, i32
  }
  func.func @transform_2(%arg0: i32, %arg1: i32, %arg2: memref<1xi32, #tpu.memory_space<smem>>, %arg3: memref<1xi32, #tpu.memory_space<smem>>) -> (i32, i32) {
    %0 = arith.index_cast %arg0 : i32 to index
    %1 = memref.load %arg3[%0] : memref<1xi32, #tpu.memory_space<smem>>
    %c0_i32 = arith.constant 0 : i32
    return %1, %arg1 : i32, i32
  }
  func.func @transform_3(%arg0: i32, %arg1: i32, %arg2: memref<1xi32, #tpu.memory_space<smem>>, %arg3: memref<1xi32, #tpu.memory_space<smem>>) -> (i32, i32) {
    %0 = arith.index_cast %arg0 : i32 to index
    %1 = memref.load %arg3[%0] : memref<1xi32, #tpu.memory_space<smem>>
    %c0_i32 = arith.constant 0 : i32
    return %1, %arg1 : i32, i32
  }
  func.func @transform_4(%arg0: i32, %arg1: i32, %arg2: memref<1xi32, #tpu.memory_space<smem>>, %arg3: memref<1xi32, #tpu.memory_space<smem>>) -> (i32, i32) {
    %0 = arith.index_cast %arg0 : i32 to index
    %1 = memref.load %arg2[%0] : memref<1xi32, #tpu.memory_space<smem>>
    %2 = arith.index_cast %arg0 : i32 to index
    %3 = memref.load %arg3[%2] : memref<1xi32, #tpu.memory_space<smem>>
    %c0_i32 = arith.constant 0 : i32
    return %1, %3 : i32, i32
  }
  func.func @transform_5(%arg0: i32, %arg1: i32, %arg2: memref<1xi32, #tpu.memory_space<smem>>, %arg3: memref<1xi32, #tpu.memory_space<smem>>) -> (i32, i32) {
    %0 = arith.index_cast %arg0 : i32 to index
    %1 = memref.load %arg2[%0] : memref<1xi32, #tpu.memory_space<smem>>
    %c0_i32 = arith.constant 0 : i32
    %c0_i32_0 = arith.constant 0 : i32
    return %1, %c0_i32 : i32, i32
  }
  func.func @transform_6(%arg0: i32, %arg1: i32, %arg2: memref<1xi32, #tpu.memory_space<smem>>, %arg3: memref<1xi32, #tpu.memory_space<smem>>) -> (i32, i32) {
    %0 = arith.index_cast %arg0 : i32 to index
    %1 = memref.load %arg3[%0] : memref<1xi32, #tpu.memory_space<smem>>
    %c0_i32 = arith.constant 0 : i32
    %c0_i32_0 = arith.constant 0 : i32
    return %c0_i32, %1 : i32, i32
  }
  func.func @transform_7(%arg0: i32, %arg1: i32, %arg2: memref<1xi32, #tpu.memory_space<smem>>, %arg3: memref<1xi32, #tpu.memory_space<smem>>) -> (i32, i32, i32) {
    %c0_i32 = arith.constant 0 : i32
    %c0_i32_0 = arith.constant 0 : i32
    %c0_i32_1 = arith.constant 0 : i32
    return %arg0, %c0_i32, %c0_i32_0 : i32, i32, i32
  }
}

</mosaic_0001>

<bundles_post_ra>
// kernel: spectral_loss.1
= control target key start
LH: loop header
LB: loop body
LE: loop exit
PB: predicated region body
PF: predicated region fallthrough
CT: control target
= control target key end

     0   :  { %v441_v0 = vmov 0.0   ;;  %vm442_vm0 = vmmov 0   ;;  %v443_v1 = vmov 0   ;;  %s562_s1 = inlined_call_operand.<no memory space> [shape: s32[1], index: 1, kind: input, shape index: {}, may-alias: {0,1}]   ;;  %s563_s0 = inlined_call_operand.<no memory space> [shape: s32[1], index: 0, kind: input, shape index: {}, may-alias: {0,1}]   ;;  %s564_s9 = inlined_call_operand.vmem [shape: f32[1,1,8], index: 9, kind: output, shape index: {}]   ;;  %s565_s4 = inlined_call_operand.vmem [shape: bf16[8,128], index: 4, kind: input, shape index: {}, may-alias: {2,4}]   ;;  %s566_s5 = inlined_call_operand.vmem [shape: bf16[8,128], index: 5, kind: input, shape index: {}, may-alias: {3,5}]   ;;  %s567_s2 = inlined_call_operand.vmem [shape: bf16[8,128], index: 2, kind: input, shape index: {}, may-alias: {2,4}]   ;;  %s568_s6 = inlined_call_operand.vmem [shape: f32[8,8], index: 6, kind: input, shape index: {}]   ;;  %s569_s7 = inlined_call_operand.vmem [shape: f32[8,1], index: 7, kind: input, shape index: {}]   ;;  %s570_s3 = inlined_call_operand.vmem [shape: bf16[8,128], index: 3, kind: input, shape index: {}, may-alias: {3,5}]   ;;  %s571_s8 = inlined_call_operand.vmem [shape: f32[1,8], index: 8, kind: input, shape index: {}]  }
   0x1   :  { %418 = vmatprep.subr.bf16.mxu0 %v441_v0  ;;  %p127_p0 = scmp.lt.s32.totalorder %s562_s1, 0  ;;  %420 = vmatprep.mubr.msk.bf16.mxu0 %vm442_vm0, %v441_v0  ;;  %p115_p1 = scmp.lt.s32.totalorder %s563_s0, 0 }
   0x2   :  { %412 = vmatprep.subr.bf16.mxu1 %v441_v0  ;;  %414 = vmatprep.mubr.msk.bf16.mxu1 %vm442_vm0, %v441_v0  ;;  %p404_p2 = scmp.eq.s32.totalorder %s563_s0, %s562_s1 }
   0x3   :  { %s505_s15 = scalar_select %p127_p0, %s562_s1, 0  ;;  %438 = vset.pattern.permute.xlu0 %v443_v1 }
   0x4   :  { %s510_s18 = scalar_select %p115_p1, %s563_s0, 0 }
   0x5   :  { %s399_s19 = sshll.u32 %s505_s15, 2  ;;  %vm319_vm3 = vcmask (!%p404_p2), 64512   ;;  %vm327_vm4 = vcmask (!%p404_p2), 57344  }
   0x6   :  { %s130_s22 = scalar_lea.vmem %s565_s4, %s399_s19  ;;  %s397_s23 = sshll.u32 %s510_s18, 2 }
   0x7   :  { %v163_v2 = vld [vmem:[%s130_s22] sm:$0xf]  ;;  %s144_s24 = sadd.s32 %s505_s15, %s510_s18  ;;  %s136_s28 = scalar_lea.vmem %s566_s5, %s399_s19 }
   0x8   :  { %419 = vmatpush3.bf16.xpose.msra.mxu0 %v163_v2  ;;  %s401_s25 = sshll.u32 %s144_s24, 3  ;;  %s118_s10 = scalar_lea.vmem %s567_s2, %s397_s23  ;;  %v164_v3 = vld [vmem:[%s136_s28] sm:$0xf] }
   0x9   :  { %s528_s13 = scalar_lea.vmem %s568_s6, %s401_s25  ;;  %424 = vmatprep.subr.bf16.mxu0 %v441_v0  ;;  %413 = vmatpush3.bf16.xpose.msra.mxu1 %v164_v3  ;;  %s402_s4 = sshll.u32 %s510_s18, 3  ;;  %v161_v4 = vld [vmem:[%s118_s10] sm:$0xf] }
   0xa   :  { %s153_s17 = scalar_lea.vmem %s569_s7, %s402_s4  ;;  %s124_s6 = scalar_lea.vmem %s570_s3, %s397_s23  ;;  %v317_v27 = vld [vmem:[%s528_s13] sm:$0xff] (!%p404_p2) }
   0xb   :  { %v286_v5 = vld [vmem:[%s153_s17] sm:$0xff]  ;;  %s158_s19 = scalar_lea.vmem %s571_s8, %s505_s15 }
   0xc   :  { %290 = vperm.xlu0 %438, %v286_v5   ;;  %v162_v6 = vld [vmem:[%s124_s6] sm:$0xf] }
   0xd   :  { %v403_v11 = vld [vmem:[%s158_s19] ss:$0 sm:$0xff] }
   0xf   :  { %421 = vmatmul.mubr.bf16.vlgmr.msra.gmra.mrb[0].mxu0 %v161_v4 }
  0x10   :  { %425 = vmatpush3.bf16.xpose.msra.mxu0 %v163_v2  ;;  %426 = vmatprep.mubr.msk.bf16.mxu0 %vm442_vm0, %v441_v0 }
  0x11   :  { %415 = vmatmul.mubr.bf16.vlgmr.msra.gmra.mrb[0].mxu1 %v161_v4 }
  0x1b   :  { %427 = vmatmul.mubr.bf16.vlgmr.msra.gmra.mrb[0].mxu0 %v162_v6 }
  0x8b   :  { %v291_v12 = vpop.permute.xlu0 %290 }
  0x8c   :  { %v299_v16 = vadd.f32 %v403_v11, %v291_v12 }
  0xe4   :  { %v199_v7 = vpop.f32.mrb[0].mxu1 }
  0xe5   :  { %v416_v8 = vpop.f32.mrb[1].mxu1 }
  0xe6   :  { %v202_v9 = vpop.f32.mrb[2].mxu1 }
  0xe7   :  { %v417_v10 = vpop.f32.mrb[3].mxu1 }
  0xee   :  { %v279_v13 = vpop.f32.mrb[0].mxu0 }
  0xef   :  { %v430_v14 = vadd.f32 %v279_v13, %v199_v7  ;;  %v428_v15 = vpop.f32.mrb[1].mxu0 }
  0xf0   :  { %v282_v17 = vpop.f32.mrb[2].mxu0 }
  0xf1   :  { %v300_v18 = vmul.f32 2.0, %v430_v14  ;;  %v429_v19 = vpop.f32.mrb[3].mxu0 }
  0xf3   :  { %v301_v20 = vsub.f32 %v299_v16, %v300_v18 }
  0xf5   :  { %v302_v21 = vmax.f32 %v301_v20, 0.0 }
  0xf7   :  { %439 = vrsqrt.f32 %v302_v21  ;;  %vm305_vm1 = vcmp.eq.f32.partialorder %v302_v21, inf  ;;  %v308_v24 = vand.u32 2147483648, %v302_v21  ;;  %vm307_vm2 = vcmp.eq.f32.partialorder %v302_v21, 0.0 }
  0xff   :  { %316 = sbr.rel (%p404_p2) target bundleno = 278 (0x116), region = 33 }
 0x101   :  { %v440_v22 = vpop.eup %439 }
 0x102   :  { %v304_v23 = vmul.f32 %v440_v22, %v302_v21 }
 0x104   :  { %v306_v25 = vsel %vm305_vm1, %v302_v21, %v304_v23 }
 0x105   :  { %v309_v26 = vsel %vm307_vm2, %v308_v24, %v306_v25 }
 0x106   :  { %v318_v28 = vmul.f32 %v317_v27, %v309_v26 }
 0x108   :  { %v320_v29 = vsel %vm319_vm3, %v318_v28, 0.0 }
 0x109   :  { %v321_v30 = vrot.slane %v320_v29, 4 }
 0x10b   :  { %v322_v31 = vadd.f32 %v321_v30, %v320_v29 }
 0x10d   :  { %v323_v32 = vrot.slane %v322_v31, 2 }
 0x10f   :  { %v324_v33 = vadd.f32 %v323_v32, %v322_v31 }
 0x111   :  { %v325_v34 = vrot.slane %v324_v33, 1 }
 0x113   :  { %v326_v35 = vadd.f32 %v325_v34, %v324_v33 }
 0x115   :  { %328 = vst.msk [vmem:[%s564_s9] sm:$0x1] %vm327_vm4, %v326_v35 }
 0x116 PF:  { %p405_p3 = scmp.ne.s32.totalorder %s563_s0, %s562_s1 }
 0x117   :  { %v332_v36 = vlaneseq (!%p405_p3)  ;;  %v338_v39 = vld [vmem:[%s528_s13] sm:$0xff] (!%p405_p3)  ;;  %vm340_vm6 = vcmask (!%p405_p3), 64512   ;;  %vm349_vm7 = vcmask (!%p405_p3), 57344  }
 0x118   :  { %331 = sbr.rel (%p405_p3) target bundleno = 303 (0x12f), region = 37 }
 0x119   :  { %v333_v37 = vshrl.u32 (!%p405_p3), %v332_v36, 7  ;;  %v335_v38 = vand.u32 (!%p405_p3), 127, %v332_v36 }
 0x11b   :  { %vm336_vm5 = vcmp.eq.s32.totalorder (!%p405_p3), %v333_v37, %v335_v38 }
 0x11c   :  { %v337_v40 = vsel (!%p405_p3), %vm336_vm5, 0.0, %v309_v26 }
 0x11d   :  { %v339_v41 = vmul.f32 (!%p405_p3), %v338_v39, %v337_v40 }
 0x11f   :  { %v341_v42 = vsel %vm340_vm6, %v339_v41, 0.0 }
 0x120   :  { %v342_v43 = vrot.slane %v341_v42, 4 }
 0x122   :  { %v343_v44 = vadd.f32 %v342_v43, %v341_v42 }
 0x124   :  { %v344_v45 = vrot.slane %v343_v44, 2 }
 0x126   :  { %v345_v46 = vadd.f32 %v344_v45, %v343_v44 }
 0x128   :  { %v346_v47 = vrot.slane %v345_v46, 1 }
 0x12a   :  { %v347_v48 = vadd.f32 %v346_v47, %v345_v46 }
 0x12c   :  { %v348_v49 = vmul.f32 0.5, %v347_v48 }
 0x12e   :  { %350 = vst.msk [vmem:[%s564_s9] sm:$0x1] %vm349_vm7, %v348_v49 }
 0x12f PF:  {}

</bundles_post_ra>
